<compile_context>
chip_gen: v7x
topology: tpu7x:2x2x1
jax: 0.10.0
libtpu: 0.0.40
codegen_flags: <defaults>
</compile_context>

<pallas_src>
import jax
import jax.numpy as jnp
import numpy as np
from jax import lax
from jax.experimental import pallas as pl
from jax.experimental.pallas import tpu as pltpu


def _attentive_pooling_kernel(first_ref, second_ref, param_ref,
                              rep1_ref, attn1_ref, rep2_ref, attn2_ref):
    first = first_ref[...]    # (T, C)  chem-side rows
    second = second_ref[...]  # (T, P)  prot-side rows
    param = param_ref[...]    # (C, P)

    # wm1 = second @ param.T : contract the P axes directly on the MXU (no transpose).
    wm1 = jnp.tanh(lax.dot_general(
        second, param,
        dimension_numbers=(((1,), (1,)), ((), ())),
        preferred_element_type=jnp.float32))                     # (T, C)
    wm2 = jnp.tanh(jnp.dot(first, param,
                           preferred_element_type=jnp.float32))  # (T, P)

    def softmax_last(x):
        m = jnp.max(x, axis=-1, keepdims=True)
        e = jnp.exp(x - m)
        # approx reciprocal -> EUP slot; one value per row, accuracy impact ~1e-4 rel.
        return e * pl.reciprocal(jnp.sum(e, axis=-1, keepdims=True), approx=True)

    s1 = softmax_last(wm1)  # (T, C)
    s2 = softmax_last(wm2)  # (T, P)

    attn1_ref[...] = s1.astype(attn1_ref.dtype)
    attn2_ref[...] = s2.astype(attn2_ref.dtype)
    rep1_ref[...] = (first.astype(jnp.float32) * s1).astype(rep1_ref.dtype)
    rep2_ref[...] = (second.astype(jnp.float32) * s2).astype(rep2_ref.dtype)


def attentive_pooling(first, second, param, *, row_tile=512):
    """first: (B, L, chem), second: (B, L, prot), param: (chem, prot)."""
    B, L1, C = first.shape
    B2, L2, P = second.shape
    assert B == B2
    # torch code multiplies first*(softmax of shape (B, L2, C)); requires L1 == L2.
    assert L1 == L2, "AttentivePooling forward requires length_1 == length_2"
    L = L1
    rows = B * L

    # Row-independent computation: flatten batch*length into one row axis and tile it.
    first2d = first.reshape(rows, C)
    second2d = second.reshape(rows, P)

    # Single block if small; otherwise 512-row (MXU-filling, multiple-of-8) tiles.
    T = rows if rows <= row_tile else row_tile
    grid = (pl.cdiv(rows, T),)

    out_shape = (
        jax.ShapeDtypeStruct((rows, C), first.dtype),   # rep_first
        jax.ShapeDtypeStruct((rows, C), first.dtype),   # score_m1 (input dtype)
        jax.ShapeDtypeStruct((rows, P), second.dtype),  # rep_second
        jax.ShapeDtypeStruct((rows, P), second.dtype),  # score_m2 (input dtype)
    )

    grid_spec = pltpu.PrefetchScalarGridSpec(
        num_scalar_prefetch=0,
        grid=grid,
        in_specs=[
            pl.BlockSpec((T, C), lambda i: (i, 0)),
            pl.BlockSpec((T, P), lambda i: (i, 0)),
            pl.BlockSpec((C, P), lambda i: (0, 0)),   # param resident across steps
        ],
        out_specs=[
            pl.BlockSpec((T, C), lambda i: (i, 0)),
            pl.BlockSpec((T, C), lambda i: (i, 0)),
            pl.BlockSpec((T, P), lambda i: (i, 0)),
            pl.BlockSpec((T, P), lambda i: (i, 0)),
        ],
    )

    rep1, attn1, rep2, attn2 = pl.pallas_call(
        _attentive_pooling_kernel,
        out_shape=out_shape,
        grid_spec=grid_spec,
        compiler_params=pltpu.CompilerParams(
            dimension_semantics=("parallel",),
            vmem_limit_bytes=32 * 1024 * 1024),
    )(first2d, second2d, param)

    return ((rep1.reshape(B, L, C), attn1.reshape(B, L, C)),
            (rep2.reshape(B, L, P), attn2.reshape(B, L, P)))


def _reference(first, second, param):
    wm1 = jnp.tanh(jnp.einsum("blp,cp->blc", second, param))
    wm2 = jnp.tanh(jnp.einsum("blc,cp->blp", first, param))
    s1 = jax.nn.softmax(wm1, axis=-1)
    s2 = jax.nn.softmax(wm2, axis=-1)
    return (first * s1, s1), (second * s2, s2)


if __name__ == "__main__":
    chem_hidden = 128
    prot_hidden = 256
    B, L = 2, 8

    key = jax.random.PRNGKey(0)
    k1, k2, k3 = jax.random.split(key, 3)
    first = jax.random.normal(k1, (B, L, chem_hidden), dtype=jnp.float32)
    second = jax.random.normal(k2, (B, L, prot_hidden), dtype=jnp.float32)
    # Module's __init__ uses zeros; use a deterministic non-trivial init instead so
    # the softmax/tanh path is actually exercised.
    param = 0.05 * jax.random.normal(k3, (chem_hidden, prot_hidden), dtype=jnp.float32)

    (rep1, attn1), (rep2, attn2) = attentive_pooling(first, second, param)
    jax.block_until_ready((rep1, attn1, rep2, attn2))

    (rrep1, rattn1), (rrep2, rattn2) = _reference(first, second, param)
    # Tolerance reflects the approx (EUP) reciprocal in the softmax denominator.
    np.testing.assert_allclose(np.asarray(rep1), np.asarray(rrep1), rtol=2e-3, atol=2e-3)
    np.testing.assert_allclose(np.asarray(attn1), np.asarray(rattn1), rtol=2e-3, atol=2e-3)
    np.testing.assert_allclose(np.asarray(rep2), np.asarray(rrep2), rtol=2e-3, atol=2e-3)
    np.testing.assert_allclose(np.asarray(attn2), np.asarray(rattn2), rtol=2e-3, atol=2e-3)

    print("KERNEL_OK")
</pallas_src>

<mosaic_0001>
module attributes {stable_mosaic.version = 11 : i64} {
  func.func @_attentive_pooling_kernel(%arg0: i32, %arg1: memref<16x128xf32, #tpu.memory_space<vmem>>, %arg2: memref<16x256xf32, #tpu.memory_space<vmem>>, %arg3: memref<128x256xf32, #tpu.memory_space<vmem>>, %arg4: memref<16x128xf32, #tpu.memory_space<vmem>>, %arg5: memref<16x128xf32, #tpu.memory_space<vmem>>, %arg6: memref<16x256xf32, #tpu.memory_space<vmem>>, %arg7: memref<16x256xf32, #tpu.memory_space<vmem>>) attributes {dimension_semantics = [#tpu.dimension_semantics<parallel>], iteration_bounds = array<i64: 1>, scalar_prefetch = 0 : i64, scratch_operands = 0 : i64, tpu.core_type = #tpu.core_type<tc>, window_params = [{transform_indices = @transform_0, window_bounds = array<i64: 16, 128>}, {transform_indices = @transform_1, window_bounds = array<i64: 16, 256>}, {pipeline_mode = #tpu.pipeline_mode<synchronous>, transform_indices = @transform_2, window_bounds = array<i64: 128, 256>}, {transform_indices = @transform_3, window_bounds = array<i64: 16, 128>}, {transform_indices = @transform_4, window_bounds = array<i64: 16, 128>}, {transform_indices = @transform_5, window_bounds = array<i64: 16, 256>}, {transform_indices = @transform_6, window_bounds = array<i64: 16, 256>}]} {
    %c0 = arith.constant 0 : index
    %c0_0 = arith.constant 0 : index
    %0 = vector.load %arg1[%c0, %c0_0] : memref<16x128xf32, #tpu.memory_space<vmem>>, vector<16x128xf32>
    %c0_1 = arith.constant 0 : index
    %c0_2 = arith.constant 0 : index
    %1 = vector.load %arg2[%c0_1, %c0_2] : memref<16x256xf32, #tpu.memory_space<vmem>>, vector<16x256xf32>
    %c0_3 = arith.constant 0 : index
    %c0_4 = arith.constant 0 : index
    %2 = vector.load %arg3[%c0_3, %c0_4] : memref<128x256xf32, #tpu.memory_space<vmem>>, vector<128x256xf32>
    %cst = arith.constant dense<0.000000e+00> : vector<16x128xf32>
    %3 = tpu.matmul %1, %2, %cst {dimension_numbers = #tpu.dot_dimension_numbers<[1], [1], [0], [0], [0, 0, 1, 0], [], []>} : vector<16x256xf32>, vector<128x256xf32>, vector<16x128xf32> -> vector<16x128xf32>
    %4 = math.tanh %3 : vector<16x128xf32>
    %cst_5 = arith.constant dense<0.000000e+00> : vector<16x256xf32>
    %5 = tpu.matmul %0, %2, %cst_5 {dimension_numbers = #tpu.dot_dimension_numbers<[1], [0], [0], [1], [0, 0, 1, 1], [], []>} : vector<16x128xf32>, vector<128x256xf32>, vector<16x256xf32> -> vector<16x256xf32>
    %6 = math.tanh %5 : vector<16x256xf32>
    %cst_6 = arith.constant dense<0xFF800000> : vector<16xf32>
    %7 = vector.multi_reduction <maximumf>, %4, %cst_6 [1] : vector<16x128xf32> to vector<16xf32>
    %8 = vector.shape_cast %7 : vector<16xf32> to vector<16x1xf32>
    %9 = vector.broadcast %8 : vector<16x1xf32> to vector<16x128xf32>
    %10 = arith.subf %4, %9 : vector<16x128xf32>
    %11 = math.exp %10 : vector<16x128xf32>
    %cst_7 = arith.constant dense<0.000000e+00> : vector<16xf32>
    %12 = vector.multi_reduction <add>, %11, %cst_7 [1] : vector<16x128xf32> to vector<16xf32>
    %13 = vector.shape_cast %12 : vector<16xf32> to vector<16x1xf32>
    %14 = tpu.reciprocal %13 {approx = true} : vector<16x1xf32> -> vector<16x1xf32>
    %15 = vector.broadcast %14 : vector<16x1xf32> to vector<16x128xf32>
    %16 = arith.mulf %11, %15 : vector<16x128xf32>
    %cst_8 = arith.constant dense<0xFF800000> : vector<16xf32>
    %17 = vector.multi_reduction <maximumf>, %6, %cst_8 [1] : vector<16x256xf32> to vector<16xf32>
    %18 = vector.shape_cast %17 : vector<16xf32> to vector<16x1xf32>
    %19 = vector.broadcast %18 : vector<16x1xf32> to vector<16x256xf32>
    %20 = arith.subf %6, %19 : vector<16x256xf32>
    %21 = math.exp %20 : vector<16x256xf32>
    %cst_9 = arith.constant dense<0.000000e+00> : vector<16xf32>
    %22 = vector.multi_reduction <add>, %21, %cst_9 [1] : vector<16x256xf32> to vector<16xf32>
    %23 = vector.shape_cast %22 : vector<16xf32> to vector<16x1xf32>
    %24 = tpu.reciprocal %23 {approx = true} : vector<16x1xf32> -> vector<16x1xf32>
    %25 = vector.broadcast %24 : vector<16x1xf32> to vector<16x256xf32>
    %26 = arith.mulf %21, %25 : vector<16x256xf32>
    %c0_10 = arith.constant 0 : index
    %c0_11 = arith.constant 0 : index
    %27 = vector.load %arg5[%c0_10, %c0_11] : memref<16x128xf32, #tpu.memory_space<vmem>>, vector<16x128xf32>
    tpu.vector_store %arg5[%c0_10, %c0_11], %16 {strides = array<i32>} : memref<16x128xf32, #tpu.memory_space<vmem>>, vector<16x128xf32>,
    %c0_12 = arith.constant 0 : index
    %c0_13 = arith.constant 0 : index
    %28 = vector.load %arg7[%c0_12, %c0_13] : memref<16x256xf32, #tpu.memory_space<vmem>>, vector<16x256xf32>
    tpu.vector_store %arg7[%c0_12, %c0_13], %26 {strides = array<i32>} : memref<16x256xf32, #tpu.memory_space<vmem>>, vector<16x256xf32>,
    %29 = arith.mulf %0, %16 : vector<16x128xf32>
    %c0_14 = arith.constant 0 : index
    %c0_15 = arith.constant 0 : index
    %30 = vector.load %arg4[%c0_14, %c0_15] : memref<16x128xf32, #tpu.memory_space<vmem>>, vector<16x128xf32>
    tpu.vector_store %arg4[%c0_14, %c0_15], %29 {strides = array<i32>} : memref<16x128xf32, #tpu.memory_space<vmem>>, vector<16x128xf32>,
    %31 = arith.mulf %1, %26 : vector<16x256xf32>
    %c0_16 = arith.constant 0 : index
    %c0_17 = arith.constant 0 : index
    %32 = vector.load %arg6[%c0_16, %c0_17] : memref<16x256xf32, #tpu.memory_space<vmem>>, vector<16x256xf32>
    tpu.vector_store %arg6[%c0_16, %c0_17], %31 {strides = array<i32>} : memref<16x256xf32, #tpu.memory_space<vmem>>, vector<16x256xf32>,
    return
  }
  func.func @transform_0(%arg0: i32) -> (i32, i32) {
    %c0_i32 = arith.constant 0 : i32
    %c0_i32_0 = arith.constant 0 : i32
    return %arg0, %c0_i32 : i32, i32
  }
  func.func @transform_1(%arg0: i32) -> (i32, i32) {
    %c0_i32 = arith.constant 0 : i32
    %c0_i32_0 = arith.constant 0 : i32
    return %arg0, %c0_i32 : i32, i32
  }
  func.func @transform_2(%arg0: i32) -> (i32, i32) {
    %c0_i32 = arith.constant 0 : i32
    %c0_i32_0 = arith.constant 0 : i32
    %c0_i32_1 = arith.constant 0 : i32
    return %c0_i32, %c0_i32_0 : i32, i32
  }
  func.func @transform_3(%arg0: i32) -> (i32, i32) {
    %c0_i32 = arith.constant 0 : i32
    %c0_i32_0 = arith.constant 0 : i32
    return %arg0, %c0_i32 : i32, i32
  }
  func.func @transform_4(%arg0: i32) -> (i32, i32) {
    %c0_i32 = arith.constant 0 : i32
    %c0_i32_0 = arith.constant 0 : i32
    return %arg0, %c0_i32 : i32, i32
  }
  func.func @transform_5(%arg0: i32) -> (i32, i32) {
    %c0_i32 = arith.constant 0 : i32
    %c0_i32_0 = arith.constant 0 : i32
    return %arg0, %c0_i32 : i32, i32
  }
  func.func @transform_6(%arg0: i32) -> (i32, i32) {
    %c0_i32 = arith.constant 0 : i32
    %c0_i32_0 = arith.constant 0 : i32
    return %arg0, %c0_i32 : i32, i32
  }
}

</mosaic_0001>

<bundles_post_ra>
// kernel: tpu_custom_call.1
= control target key start
LH: loop header
LB: loop body
LE: loop exit
PB: predicated region body
PF: predicated region fallthrough
CT: control target
= control target key end

     0   :  { %12 = vsyncpa [#allocation3], 0  ;;  %s870_s0 = inlined_call_operand.hbm [shape: f32[16,128], index: 0, kind: input, shape index: {}]   ;;  %s871_s1 = inlined_call_operand.hbm [shape: f32[16,256], index: 1, kind: input, shape index: {}]   ;;  %s872_s2 = inlined_call_operand.hbm [shape: f32[128,256], index: 2, kind: input, shape index: {}]   ;;  %s873_s3 = inlined_call_operand.hbm [shape: f32[16,128], index: 3, kind: output, shape index: {0}]   ;;  %s874_s4 = inlined_call_operand.hbm [shape: f32[16,128], index: 4, kind: output, shape index: {1}]   ;;  %s875_s5 = inlined_call_operand.hbm [shape: f32[16,256], index: 5, kind: output, shape index: {2}]   ;;  %s876_s6 = inlined_call_operand.hbm [shape: f32[16,256], index: 6, kind: output, shape index: {3}]  }
   0x1   :  { %13 = vsyncpa [#allocation6], 0 }
   0x2   :  { %14 = vsyncpa [#allocation4], 0 }
   0x3   :  { %15 = vsyncpa [#allocation10], 0 }
   0x4   :  { %16 = vsyncpa [#allocation13], 0  ;;  %s661_s21 = smov [#allocation5]   ;;  %s497_s25 = scalar_lea.hbm %s871_s1, 512 }
   0x5   :  { %s34_s22 = sshll.u32 %s661_s21, 4  ;;  %p498_p0 = scmp.ne.s32.totalorder %s871_s1, %s497_s25  ;;  %s35_s22 = int_to_ptr.vmem [resolvable:$true] %s34_s22 }
   0x6   :  { %p501_p1 = scmp.lt.u32.totalorder %s497_s25, %s871_s1 }
   0x8   :  { %p503_p2 = pnand %p501_p1, %p498_p0 }
   0xa   :  { %506 = shalt.err (!%p503_p2)
}
   0xb   :  { %s507_s30 = scalar_lea.vmem %s35_s22, 512  ;;  %p512_p4 = scmp.lt.s32.totalorder %s35_s22, %s35_s22 }
   0xc   :  { %p508_p3 = scmp.ne.s32.totalorder %s35_s22, %s507_s30  ;;  %p513_p5 = scmp.lt.s32.totalorder %s507_s30, %s507_s30 }
   0xe   :  { %p514_p6 = por %p513_p5, %p512_p4 }
  0x10   :  { %p515_p7 = pnand %p514_p6, %p508_p3 }
  0x12   :  { %518 = shalt.err (!%p515_p7)
}
  0x13   :  { %s662_s7 = smov 256   ;;  %s663_s8 = smov 16  }
  0x14   :  { %40 = dma.hbm_to_vmem [thread:$0]  %s871_s1, 512, %s35_s22, [#allocation6], %s662_s7, %s662_s7, %s663_s8  }
  0x15   :  { %s664_s11 = smov [#allocation2]   ;;  %s519_s15 = scalar_lea.hbm %s870_s0, 256 }
  0x16   :  { %s22_s12 = sshll.u32 %s664_s11, 4  ;;  %p520_p8 = scmp.ne.s32.totalorder %s870_s0, %s519_s15  ;;  %s23_s12 = int_to_ptr.vmem [resolvable:$true] %s22_s12 }
  0x17   :  { %p523_p9 = scmp.lt.u32.totalorder %s519_s15, %s870_s0 }
  0x19   :  { %p525_p10 = pnand %p523_p9, %p520_p8 }
  0x1b   :  { %528 = shalt.err (!%p525_p10)
}
  0x1c   :  { %s529_s20 = scalar_lea.vmem %s23_s12, 256  ;;  %p534_p12 = scmp.lt.s32.totalorder %s23_s12, %s23_s12 }
  0x1d   :  { %p530_p11 = scmp.ne.s32.totalorder %s23_s12, %s529_s20  ;;  %p535_p13 = scmp.lt.s32.totalorder %s529_s20, %s529_s20 }
  0x1f   :  { %p536_p0 = por %p535_p13, %p534_p12 }
  0x21   :  { %p537_p1 = pnand %p536_p0, %p530_p11 }
  0x23   :  { %540 = shalt.err (!%p537_p1)
}
  0x24   :  { %s665_s1 = smov 128   ;;  %s666_s21 = smov 8  }
  0x25   :  { %28 = dma.hbm_to_vmem [thread:$0]  %s870_s0, 256, %s23_s12, [#allocation3], %s665_s1, %s665_s1, %s666_s21  }
  0x26   :  { %s667_s24 = smov [#allocation7]   ;;  %s541_s28 = scalar_lea.hbm %s872_s2, 4096 }
  0x27   :  { %s46_s25 = sshll.u32 %s667_s24, 4  ;;  %p542_p2 = scmp.ne.s32.totalorder %s872_s2, %s541_s28  ;;  %s47_s25 = int_to_ptr.vmem [resolvable:$true] %s46_s25 }
  0x28   :  { %p545_p3 = scmp.lt.u32.totalorder %s541_s28, %s872_s2 }
  0x2a   :  { %p547_p4 = pnand %p545_p3, %p542_p2 }
  0x2c   :  { %550 = shalt.err (!%p547_p4)
}
  0x2d   :  { %s551_s11 = scalar_lea.vmem %s47_s25, 4096  ;;  %p556_p6 = scmp.lt.s32.totalorder %s47_s25, %s47_s25 }
  0x2e   :  { %p552_p5 = scmp.ne.s32.totalorder %s47_s25, %s551_s11  ;;  %p557_p7 = scmp.lt.s32.totalorder %s551_s11, %s551_s11 }
  0x30   :  { %p558_p8 = por %p557_p7, %p556_p6 }
  0x32   :  { %p559_p9 = pnand %p558_p8, %p552_p5 }
  0x34   :  { %562 = shalt.err (!%p559_p9)
}
  0x35   :  { %52 = dma.hbm_to_vmem [thread:$0]  %s872_s2, 4096, %s47_s25, [#allocation6], %s662_s7, %s662_s7, %s663_s8  }
  0x36   :  { %651 = dma.done.wait [#allocation3], 256  }
  0x37   :  { %652 = vsyncadd [#allocation3], 4294967040 }
  0x38   :  { %653 = dma.done.wait [#allocation6], 4608  }
  0x39   :  { %654 = vsyncadd [#allocation6], 4294962688  ;;  %v668_v0 = vmov 0.0   ;;  %v69_v1 = vld [vmem:[#allocation7 + $0x8] sm:$0xff]  ;;  %v71_v2 = vld [vmem:[#allocation7 + $0x18] sm:$0xff]  ;;  %s669_s2 = smov [#allocation9]  }
  0x3a   :  { %241 = vmatprep.mubr.f32.mxu1 %v668_v0  ;;  %v68_v3 = vld [vmem:[#allocation7] sm:$0xff]  ;;  %v389_v4 = vpack.c.bf16 %v71_v2, %v69_v1  ;;  %v70_v5 = vld [vmem:[#allocation7 + $0x10] sm:$0xff]  ;;  %v73_v6 = vld [vmem:[#allocation7 + $0x28] sm:$0xff]  ;;  %s341_s13 = sshll.u32 %s669_s2, 4  ;;  %s670_s14 = smov [#allocation8]   ;;  %s774_s13 = int_to_ptr.vmem [resolvable:$true] %s341_s13 }
  0x3b   :  { %v75_v7 = vld [vmem:[#allocation7 + $0x38] sm:$0xff]  ;;  %v391_v8 = vpack.c.bf16 %v70_v5, %v68_v3  ;;  %v72_v10 = vld [vmem:[#allocation7 + $0x20] sm:$0xff]  ;;  %v74_v11 = vld [vmem:[#allocation7 + $0x30] sm:$0xff]  ;;  %s329_s15 = sshll.u32 %s670_s14, 4  ;;  %s671_s16 = smov [#allocation12]   ;;  %s777_s15 = int_to_ptr.vmem [resolvable:$true] %s329_s15 }
  0x3c   :  { %v393_v9 = vpack.c.bf16 %v75_v7, %v73_v6  ;;  %v77_v12 = vld [vmem:[#allocation7 + $0x48] sm:$0xff]  ;;  %390 = vmatprep.subr.bf16.mxu0 %v389_v4  ;;  %422 = vmatprep.subr.bf16.mxu1 %v389_v4  ;;  %v79_v13 = vld [vmem:[#allocation7 + $0x58] sm:$0xff]  ;;  %v395_v14 = vpack.c.bf16 %v74_v11, %v72_v10  ;;  %v76_v16 = vld [vmem:[#allocation7 + $0x40] sm:$0xff]  ;;  %s365_s17 = sshll.u32 %s671_s16, 4  ;;  %s672_s18 = smov [#allocation11]   ;;  %s803_s17 = int_to_ptr.vmem [resolvable:$true] %s365_s17 }
  0x3d   :  { %392 = vmatpush1.bf16.xpose.msra.mxu0 %v391_v8  ;;  %424 = vmatpush1.bf16.msra.mxu1 %v391_v8  ;;  %v397_v15 = vpack.c.bf16 %v79_v13, %v77_v12  ;;  %v78_v17 = vld [vmem:[#allocation7 + $0x50] sm:$0xff]  ;;  %v81_v18 = vld [vmem:[#allocation7 + $0x68] sm:$0xff]  ;;  %v83_v19 = vld [vmem:[#allocation7 + $0x78] sm:$0xff]  ;;  %s779_s19 = sshll.u32 %s672_s18, 4  ;;  %s563_s20 = scalar_lea.vmem %s774_s13, 256  ;;  %s828_s19 = int_to_ptr.vmem [resolvable:$true] %s779_s19 }
  0x3e   :  { %426 = vmatprep.subr.bf16.mxu1 %v393_v9  ;;  %394 = vmatprep.subr.bf16.mxu0 %v393_v9  ;;  %v399_v20 = vpack.c.bf16 %v78_v17, %v76_v16  ;;  %v401_v21 = vpack.c.bf16 %v83_v19, %v81_v18  ;;  %v80_v22 = vld [vmem:[#allocation7 + $0x60] sm:$0xff]  ;;  %v82_v23 = vld [vmem:[#allocation7 + $0x70] sm:$0xff]  ;;  %v85_v24 = vld [vmem:[#allocation7 + $0x88] sm:$0xff]  ;;  %p564_p10 = scmp.ne.s32.totalorder %s774_s13, %s563_s20  ;;  %p568_p11 = scmp.lt.s32.totalorder %s774_s13, %s774_s13 }
  0x3f   :  { %v87_v25 = vld [vmem:[#allocation7 + $0x98] sm:$0xff]  ;;  %v754_v26 = vld [vmem:[#allocation5 + $0x8] sm:$0xff]  ;;  %v403_v27 = vpack.c.bf16 %v82_v23, %v80_v22  ;;  %v84_v29 = vld [vmem:[#allocation7 + $0x80] sm:$0xff]  ;;  %p569_p12 = scmp.lt.s32.totalorder %s563_s20, %s563_s20 }
  0x40   :  { %v405_v28 = vpack.c.bf16 %v87_v25, %v85_v24  ;;  %v86_v30 = vld [vmem:[#allocation7 + $0x90] sm:$0xff]  ;;  %v89_v31 = vld [vmem:[#allocation7 + $0xa8] sm:$0xff]  ;;  %v91_v32 = vld [vmem:[#allocation7 + $0xb8] sm:$0xff]  ;;  %164 = vmatprep.mubr.f32.mxu0 %v754_v26 }
  0x41   :  { %428 = vmatpush1.bf16.msra.mxu1 %v395_v14  ;;  %v407_v33 = vpack.c.bf16 %v86_v30, %v84_v29  ;;  %v409_v34 = vpack.c.bf16 %v91_v32, %v89_v31  ;;  %v88_v35 = vld [vmem:[#allocation7 + $0xa0] sm:$0xff]  ;;  %v90_v36 = vld [vmem:[#allocation7 + $0xb0] sm:$0xff]  ;;  %v93_v37 = vld [vmem:[#allocation7 + $0xc8] sm:$0xff]  ;;  %p570_p13 = por %p569_p12, %p568_p11 }
  0x42   :  { %430 = vmatprep.subr.bf16.mxu1 %v397_v15  ;;  %v95_v38 = vld [vmem:[#allocation7 + $0xd8] sm:$0xff]  ;;  %v411_v39 = vpack.c.bf16 %v90_v36, %v88_v35  ;;  %v92_v41 = vld [vmem:[#allocation7 + $0xc0] sm:$0xff]  ;;  %v94_v42 = vld [vmem:[#allocation7 + $0xd0] sm:$0xff] }
  0x43   :  { %v413_v40 = vpack.c.bf16 %v95_v38, %v93_v37  ;;  %v97_v43 = vld [vmem:[#allocation7 + $0xe8] sm:$0xff]  ;;  %v99_v44 = vld [vmem:[#allocation7 + $0xf8] sm:$0xff]  ;;  %v415_v45 = vpack.c.bf16 %v94_v42, %v92_v41  ;;  %v96_v47 = vld [vmem:[#allocation7 + $0xe0] sm:$0xff]  ;;  %p571_p0 = pnand %p570_p13, %p564_p10 }
  0x44   :  { %v417_v46 = vpack.c.bf16 %v99_v44, %v97_v43  ;;  %v98_v48 = vld [vmem:[#allocation7 + $0xf0] sm:$0xff]  ;;  %v761_v51 = vld [vmem:[#allocation2 + $0x8] sm:$0xff]  ;;  %v764_v52 = vld [vmem:[#allocation5] sm:$0xff] }
  0x45   :  { %396 = vmatpush1.bf16.xpose.msra.mxu0 %v395_v14  ;;  %432 = vmatpush1.bf16.msra.mxu1 %v399_v20  ;;  %v419_v49 = vpack.c.bf16 %v98_v48, %v96_v47  ;;  %v757_v50 = vld [vmem:[#allocation2] sm:$0xff]  ;;  %v766_v53 = vld [vmem:[#allocation5 + $0x18] sm:$0xff] }
  0x46   :  { %434 = vmatprep.subr.bf16.mxu1 %v401_v21  ;;  %398 = vmatprep.subr.bf16.mxu0 %v397_v15  ;;  %v770_v54 = vld [vmem:[#allocation5 + $0x10] sm:$0xff] }
  0x49   :  { %436 = vmatpush1.bf16.msra.mxu1 %v403_v27 }
  0x4a   :  { %438 = vmatprep.subr.bf16.mxu1 %v405_v28 }
  0x4d   :  { %400 = vmatpush1.bf16.xpose.msra.mxu0 %v399_v20  ;;  %440 = vmatpush1.bf16.msra.mxu1 %v407_v33 }
  0x4e   :  { %442 = vmatprep.subr.bf16.mxu1 %v409_v34  ;;  %402 = vmatprep.subr.bf16.mxu0 %v401_v21 }
  0x51   :  { %444 = vmatpush1.bf16.msra.mxu1 %v411_v39 }
  0x52   :  { %446 = vmatprep.subr.bf16.mxu1 %v413_v40 }
  0x55   :  { %404 = vmatpush1.bf16.xpose.msra.mxu0 %v403_v27  ;;  %448 = vmatpush1.bf16.msra.mxu1 %v415_v45 }
  0x56   :  { %450 = vmatprep.subr.bf16.mxu1 %v417_v46  ;;  %406 = vmatprep.subr.bf16.mxu0 %v405_v28 }
  0x59   :  { %452 = vmatpush1.bf16.msra.mxu1 %v419_v49 }
  0x5c   :  { %242 = vmatmul.mubr.f32.vlgmr.msra.gmra.mrb[0].mxu1 %v757_v50 }
  0x5d   :  { %408 = vmatpush1.bf16.xpose.msra.mxu0 %v407_v33  ;;  %247 = vmatprep.mubr.f32.mxu1 %v668_v0 }
  0x5e   :  { %410 = vmatprep.subr.bf16.mxu0 %v409_v34 }
  0x60   :  { %248 = vmatmul.mubr.f32.gmra.mrb[2].mxu1 %v761_v51 }
  0x65   :  { %412 = vmatpush1.bf16.xpose.msra.mxu0 %v411_v39 }
  0x66   :  { %414 = vmatprep.subr.bf16.mxu0 %v413_v40 }
  0x6d   :  { %416 = vmatpush1.bf16.xpose.msra.mxu0 %v415_v45 }
  0x6e   :  { %418 = vmatprep.subr.bf16.mxu0 %v417_v46 }
  0x75   :  { %420 = vmatpush1.bf16.xpose.msra.mxu0 %v419_v49 }
  0x7c   :  { %165 = vmatmul.mubr.f32.vlgmr.msra.gmra.mrb[0].mxu0 %v764_v52 }
  0x7d   :  { %169 = vmatprep.mubr.f32.mxu0 %v766_v53 }
  0x80   :  { %170 = vmatmul.mubr.f32.gmra.mrb[2].mxu0 %v770_v54 }
 0x12f   :  { %v243_v55 = vpop.f32.mrb[0].mxu1 }
 0x130   :  { %465 = vtanh.f32 %v243_v55  ;;  %v245_v56 = vpop.f32.mrb[1].mxu1 }
 0x131   :  { %467 = vtanh.f32 %v245_v56 }
 0x133   :  { %v249_v57 = vpop.f32.mrb[2].mxu1 }
 0x134   :  { %469 = vtanh.f32 %v249_v57  ;;  %v251_v58 = vpop.f32.mrb[3].mxu1 }
 0x135   :  { %471 = vtanh.f32 %v251_v58 }
 0x13a   :  { %v466_v59 = vpop.eup %465 }
 0x13b   :  { %v468_v60 = vpop.eup %467 }
 0x13c   :  { %v276_v61 = vmax.f32 %v466_v59, %v468_v60 }
 0x13e   :  { %v470_v62 = vpop.eup %469  ;;  %277 = vmax.xlane.f32.xlu0 %v276_v61 }
 0x13f   :  { %v472_v63 = vpop.eup %471 }
 0x140   :  { %v279_v0 = vmax.f32 %v470_v62, %v472_v63 }
 0x142   :  { %280 = vmax.xlane.f32.xlu0 %v279_v0 }
 0x14f   :  { %v166_v1 = vpop.f32.mrb[0].mxu0 }
 0x150   :  { %473 = vtanh.f32 %v166_v1  ;;  %v168_v2 = vpop.f32.mrb[1].mxu0 }
 0x153   :  { %v171_v3 = vpop.f32.mrb[2].mxu0 }
 0x154   :  { %475 = vtanh.f32 %v171_v3  ;;  %v173_v4 = vpop.f32.mrb[3].mxu0 }
 0x15a   :  { %v474_v5 = vpop.eup %473 }
 0x15b   :  { %258 = vmax.xlane.f32.xlu1 %v474_v5 }
 0x15e   :  { %v476_v6 = vpop.eup %475 }
 0x15f   :  { %260 = vmax.xlane.f32.xlu1 %v476_v6 }
 0x1cb   :  { %v278_v7 = vpop.xlane.xlu0 %277 }
 0x1cc   :  { %v282_v8 = vsub.f32 %v466_v59, %v278_v7  ;;  %v283_v9 = vsub.f32 %v468_v60, %v278_v7 }
 0x1ce   :  { %v286_v11 = vmul.f32 1.442695, %v282_v8  ;;  %v288_v13 = vmul.f32 1.442695, %v283_v9 }
 0x1cf   :  { %v281_v10 = vpop.xlane.xlu0 %280 }
 0x1d0   :  { %v284_v12 = vsub.f32 %v470_v62, %v281_v10  ;;  %v285_v14 = vsub.f32 %v472_v63, %v281_v10  ;;  %477 = vpow2.f32 %v286_v11 }
 0x1d1   :  { %479 = vpow2.f32 %v288_v13 }
 0x1d2   :  { %v290_v17 = vmul.f32 1.442695, %v284_v12  ;;  %v292_v19 = vmul.f32 1.442695, %v285_v14 }
 0x1da   :  { %v478_v23 = vpop.eup %477 }
 0x1db   :  { %v480_v24 = vpop.eup %479 }
 0x1dc   :  { %v294_v29 = vadd.f32 %v480_v24, %v478_v23 }
 0x1e8   :  { %v259_v15 = vpop.xlane.xlu1 %258 }
 0x1e9   :  { %v262_v16 = vsub.f32 %v474_v5, %v259_v15 }
 0x1eb   :  { %v264_v18 = vmul.f32 1.442695, %v262_v16 }
 0x1ec   :  { %v261_v20 = vpop.xlane.xlu1 %260 }
 0x1ed   :  { %481 = vpow2.f32 %v264_v18  ;;  %v263_v21 = vsub.f32 %v476_v6, %v261_v20 }
 0x1ee   :  { %483 = vpow2.f32 %v290_v17 }
 0x1ef   :  { %v266_v22 = vmul.f32 1.442695, %v263_v21  ;;  %485 = vpow2.f32 %v292_v19 }
 0x1f1   :  { %487 = vpow2.f32 %v266_v22 }
 0x1f7   :  { %v482_v25 = vpop.eup %481 }
 0x1f8   :  { %268 = vadd.xlane.f32.xlu0 %v482_v25  ;;  %v484_v27 = vpop.eup %483 }
 0x1f9   :  { %v486_v28 = vpop.eup %485 }
 0x1fa   :  { %v297_v31 = vadd.f32 %v486_v28, %v484_v27 }
 0x1fb   :  { %v488_v30 = vpop.eup %487 }
 0x1fc   :  { %270 = vadd.xlane.f32.xlu1 %v488_v30  ;;  %295 = vadd.xlane.f32.xlu0 %v294_v29 }
 0x200   :  { %298 = vadd.xlane.f32.xlu1 %v297_v31 }
 0x285   :  { %v269_v32 = vpop.xlane.xlu0 %268 }
 0x286   :  { %489 = vrcp.f32 %v269_v32 }
 0x289   :  { %v271_v33 = vpop.xlane.xlu1 %270  ;;  %v296_v34 = vpop.xlane.xlu0 %295 }
 0x28a   :  { %491 = vrcp.f32 %v271_v33 }
 0x28b   :  { %493 = vrcp.f32 %v296_v34 }
 0x28d   :  { %v299_v35 = vpop.xlane.xlu1 %298 }
 0x28e   :  { %495 = vrcp.f32 %v299_v35 }
 0x290   :  { %v490_v36 = vpop.eup %489 }
 0x291   :  { %v274_v37 = vmul.f32 %v490_v36, %v482_v25 }
 0x293   :  { %306 = vst [vmem:[#allocation9] sm:$0xff] %v274_v37  ;;  %v312_v38 = vmul.f32 %v274_v37, %v757_v50 }
 0x294   :  { %v492_v39 = vpop.eup %491 }
 0x295   :  { %v494_v40 = vpop.eup %493  ;;  %v275_v41 = vmul.f32 %v492_v39, %v488_v30  ;;  %314 = vst [vmem:[#allocation8] sm:$0xff] %v312_v38 }
 0x296   :  { %v302_v42 = vmul.f32 %v494_v40, %v478_v23  ;;  %v303_v43 = vmul.f32 %v494_v40, %v480_v24 }
 0x297   :  { %307 = vst [vmem:[#allocation9 + $0x8] sm:$0xff] %v275_v41  ;;  %v313_v44 = vmul.f32 %v275_v41, %v761_v51 }
 0x298   :  { %v496_v45 = vpop.eup %495  ;;  %v316_v46 = vmul.f32 %v302_v42, %v764_v52  ;;  %v317_v47 = vmul.f32 %v303_v43, %v754_v26  ;;  %308 = vst [vmem:[#allocation12] sm:$0xff] %v302_v42  ;;  %309 = vst [vmem:[#allocation12 + $0x8] sm:$0xff] %v303_v43 }
 0x299   :  { %574 = shalt.err (!%p571_p0)
}
 0x29a   :  { %s575_s24 = scalar_lea.hbm %s874_s4, 256 }
 0x29b   :  { %p576_p1 = scmp.ne.s32.totalorder %s874_s4, %s575_s24  ;;  %p579_p2 = scmp.lt.u32.totalorder %s575_s24, %s874_s4 }
 0x29d   :  { %p581_p3 = pnand %p579_p2, %p576_p1 }
 0x29f   :  { %584 = shalt.err (!%p581_p3)
}
 0x2a0   :  { %347 = dma.vmem_to_hbm [thread:$0]  %s774_s13, 256, %s874_s4, [#allocation10], %s665_s1, %s665_s1, %s666_s21   ;;  %v304_v26 = vmul.f32 %v496_v45, %v484_v27  ;;  %v305_v48 = vmul.f32 %v496_v45, %v486_v28  ;;  %315 = vst [vmem:[#allocation8 + $0x8] sm:$0xff] %v313_v44  ;;  %320 = vst [vmem:[#allocation11] sm:$0xff] %v316_v46 }
 0x2a1   :  { %321 = vst [vmem:[#allocation11 + $0x8] sm:$0xff] %v317_v47  ;;  %s585_s9 = scalar_lea.vmem %s777_s15, 256  ;;  %p590_p5 = scmp.lt.s32.totalorder %s777_s15, %s777_s15 }
 0x2a2   :  { %p586_p4 = scmp.ne.s32.totalorder %s777_s15, %s585_s9  ;;  %p591_p6 = scmp.lt.s32.totalorder %s585_s9, %s585_s9 }
 0x2a4   :  { %p592_p7 = por %p591_p6, %p590_p5 }
 0x2a6   :  { %p593_p8 = pnand %p592_p7, %p586_p4 }
 0x2a8   :  { %596 = shalt.err (!%p593_p8)
}
 0x2a9   :  { %s597_s0 = scalar_lea.hbm %s873_s3, 256 }
 0x2aa   :  { %p598_p9 = scmp.ne.s32.totalorder %s873_s3, %s597_s0  ;;  %p601_p10 = scmp.lt.u32.totalorder %s597_s0, %s873_s3 }
 0x2ac   :  { %p603_p11 = pnand %p601_p10, %p598_p9 }
 0x2ae   :  { %606 = shalt.err (!%p603_p11)
}
 0x2af   :  { %335 = dma.vmem_to_hbm [thread:$0]  %s777_s15, 256, %s873_s3, [#allocation4], %s665_s1, %s665_s1, %s666_s21   ;;  %v318_v49 = vmul.f32 %v304_v26, %v770_v54  ;;  %v319_v50 = vmul.f32 %v305_v48, %v766_v53  ;;  %310 = vst [vmem:[#allocation12 + $0x10] sm:$0xff] %v304_v26  ;;  %311 = vst [vmem:[#allocation12 + $0x18] sm:$0xff] %v305_v48 }
 0x2b0   :  { %s607_s18 = scalar_lea.vmem %s803_s17, 512  ;;  %p612_p13 = scmp.lt.s32.totalorder %s803_s17, %s803_s17 }
 0x2b1   :  { %p608_p12 = scmp.ne.s32.totalorder %s803_s17, %s607_s18  ;;  %p613_p0 = scmp.lt.s32.totalorder %s607_s18, %s607_s18 }
 0x2b3   :  { %p614_p1 = por %p613_p0, %p612_p13 }
 0x2b5   :  { %p615_p2 = pnand %p614_p1, %p608_p12 }
 0x2b7   :  { %618 = shalt.err (!%p615_p2)
}
 0x2b8   :  { %s619_s3 = scalar_lea.hbm %s876_s6, 512 }
 0x2b9   :  { %p620_p3 = scmp.ne.s32.totalorder %s876_s6, %s619_s3  ;;  %p623_p4 = scmp.lt.u32.totalorder %s619_s3, %s876_s6 }
 0x2bb   :  { %p625_p5 = pnand %p623_p4, %p620_p3 }
 0x2bd   :  { %628 = shalt.err (!%p625_p5)
}
 0x2be   :  { %371 = dma.vmem_to_hbm [thread:$0]  %s803_s17, 512, %s876_s6, [#allocation13], %s662_s7, %s662_s7, %s663_s8   ;;  %322 = vst [vmem:[#allocation11 + $0x10] sm:$0xff] %v318_v49  ;;  %323 = vst [vmem:[#allocation11 + $0x18] sm:$0xff] %v319_v50 }
 0x2bf   :  { %s629_s26 = scalar_lea.vmem %s828_s19, 512  ;;  %p634_p7 = scmp.lt.s32.totalorder %s828_s19, %s828_s19 }
 0x2c0   :  { %p630_p6 = scmp.ne.s32.totalorder %s828_s19, %s629_s26  ;;  %p635_p8 = scmp.lt.s32.totalorder %s629_s26, %s629_s26 }
 0x2c2   :  { %p636_p9 = por %p635_p8, %p634_p7 }
 0x2c4   :  { %p637_p10 = pnand %p636_p9, %p630_p6 }
 0x2c6   :  { %640 = shalt.err (!%p637_p10)
}
 0x2c7   :  { %s641_s29 = scalar_lea.hbm %s875_s5, 512 }
 0x2c8   :  { %p642_p11 = scmp.ne.s32.totalorder %s875_s5, %s641_s29  ;;  %p645_p12 = scmp.lt.u32.totalorder %s641_s29, %s875_s5 }
 0x2ca   :  { %p647_p13 = pnand %p645_p12, %p642_p11 }
 0x2cc   :  { %650 = shalt.err (!%p647_p13)
}
 0x2cd   :  { %359 = dma.vmem_to_hbm [thread:$0]  %s828_s19, 512, %s875_s5, [#allocation10], %s662_s7, %s662_s7, %s663_s8  }
 0x2ce   :  { %655 = dma.done.wait [#allocation4], 256  }
 0x2cf   :  { %656 = vsyncadd [#allocation4], 4294967040 }
 0x2d0   :  { %657 = dma.done.wait [#allocation10], 768  }
 0x2d1   :  { %658 = vsyncadd [#allocation10], 4294966528 }
 0x2d2   :  { %659 = dma.done.wait [#allocation13], 512  }
 0x2d3   :  { %660 = vsyncadd [#allocation13], 4294966784 }
 0x2d4   :  { %384 = vsyncpa [#allocation3], 1 }
 0x2d5   :  { %385 = vsyncpa [#allocation6], 1 }
 0x2d6   :  { %386 = vsyncpa [#allocation4], 1 }
 0x2d7   :  { %387 = vsyncpa [#allocation10], 1 }
 0x2d8   :  { %388 = vsyncpa [#allocation13], 1 }

</bundles_post_ra>
